<compile_context>
chip_gen: v7x
topology: tpu7x:2x2x1
jax: 0.10.0
libtpu: 0.0.40
codegen_flags: <defaults>
</compile_context>

<pallas_src>
import jax
import jax.numpy as jnp
from jax import lax
from jax.experimental import pallas as pl
from jax.experimental.pallas import tpu as pltpu


# ---------------------------------------------------------------------------
# Fused kernel: QKV projection + per-head cosine linear attention + output
# projection for b_blk batch rows per grid step.
#   x    : (b_blk, C, d)
#   Wqkv : (d, 3d)    pre-transposed & concatenated  [Wq^T | Wk^T | Wv^T]
#   Wo   : (d, d)     pre-transposed
#   S2   : (2d, 2H)   block-diag head indicator for [q | k]
#   HM   : (d, d)     same-head mask with 1 / C**sigmoid(norm_const_h) folded in
#   lens : (N,) int32 (scalar-prefetched, SMEM)
# ---------------------------------------------------------------------------
def _fused_cosine_attn_kernel(lens_ref, x_ref, wqkv_ref, wo_ref, s2_ref,
                              hm_ref, o_ref):
    f32 = jnp.float32
    b_blk, C, d = x_ref.shape
    M = b_blk * C
    mm_dt = wqkv_ref.dtype                      # MXU operand dtype (f32 / bf16)

    # ---- fused QKV projection: one MXU push --------------------------------
    x2 = x_ref[...].reshape(M, d).astype(mm_dt)
    qkv = jnp.dot(x2, wqkv_ref[...], preferred_element_type=f32)      # (M, 3d)

    # ---- sequence mask from scalar-prefetched lengths (no mask DMA) --------
    base = pl.program_id(0) * b_blk
    pos = lax.broadcasted_iota(jnp.int32, (b_blk, C, 1), 1)
    if b_blk == 1:
        m3 = (pos < lens_ref[base]).astype(f32)
    else:
        bidx = lax.broadcasted_iota(jnp.int32, (b_blk, C, 1), 0)
        m3 = jnp.zeros((b_blk, C, 1), f32)
        for b in range(b_blk):                  # static, small unrolled loop
            m3 = jnp.where(bidx == b,
                           (pos < lens_ref[base + b]).astype(f32), m3)
    m = m3.reshape(M, 1)                        # (M, 1) float 0/1

    # ---- merged per-head L2 normalization of q and k (torch F.normalize) ---
    # rsqrt(max(ss, 1e-24)) == 1 / max(||.||, 1e-12); mask folded into the
    # (M, 2H) inverse-norm instead of two (M, d) multiplies.
    qk = qkv[:, : 2 * d]                        # (M, 2d)  [q | k] along lanes
    S2 = s2_ref[...]                            # (2d, 2H)
    ss = jnp.dot(qk * qk, S2, preferred_element_type=f32)             # (M, 2H)
    inv = lax.rsqrt(jnp.maximum(ss, f32(1e-24))) * m                  # EUP + VPU
    inv_full = lax.dot_general(inv, S2, (((1,), (1,)), ((), ())),
                               preferred_element_type=f32)            # (M, 2d)
    qk_n = qk * inv_full                        # normalized & masked [qn | kn]

    qn = qk_n[:, :d].reshape(b_blk, C, d).astype(mm_dt)
    kn = qk_n[:, d:].reshape(b_blk, C, d).astype(mm_dt)
    v = qkv[:, 2 * d:].reshape(b_blk, C, d).astype(mm_dt)

    # ---- cosine linear attention (per row; per head via block-diagonal HM) --
    # kv[b, i, j] = sum_c kn[b, c, i] * v[b, c, j]  (contract over C directly)
    kv = jnp.einsum("bci,bcj->bij", kn, v, preferred_element_type=f32)  # (b,d,d)
    kv = kv * hm_ref[...]      # keep same-head blocks + per-head value scale
    attn = jnp.einsum("bci,bij->bcj", qn, kv.astype(mm_dt),
                      preferred_element_type=f32)                       # (b,C,d)

    # ---- output projection --------------------------------------------------
    out = jnp.dot(attn.reshape(M, d).astype(mm_dt), wo_ref[...],
                  preferred_element_type=f32)
    o_ref[...] = out.reshape(b_blk, C, d).astype(o_ref.dtype)


# ---------------------------------------------------------------------------
# Batch-rows-per-step selection: fill the MXU M-dim (target ~256 rows) while
# keeping >= 2 parallel grid steps (when possible) so both v7x TCs get work.
# ---------------------------------------------------------------------------
def _pick_b_blk(N, C, target_rows=256):
    divisors = [b for b in range(1, N + 1) if N % b == 0]
    b = 1
    for cand in divisors:
        if cand * C <= target_rows:
            b = cand
    while b > 1 and N // b < 2:
        b = max(c for c in divisors if c < b)
    return b


# ---------------------------------------------------------------------------
# Wrapper: builds fused weights / head-indicator matrices and runs the kernel.
# `lengths[n]` = number of valid (unmasked) positions of batch row n — the
# padding-mask case the module is used with.  (A general boolean mask could
# still be passed as an (N, C) array input instead of scalar prefetch.)
# ---------------------------------------------------------------------------
def attention_forward(params, x, lengths, *, b_blk=None, matmul_dtype=None):
    N, C, d = x.shape
    H = int(params["num_heads"])
    hd = d // H
    out_dtype = x.dtype
    mm_dt = jnp.dtype(matmul_dtype) if matmul_dtype is not None else x.dtype
    if b_blk is None:
        b_blk = _pick_b_blk(N, C)
    assert N % b_blk == 0, "b_blk must divide the batch size"

    # nn.Linear stores weight (out, in): y = x @ W^T.  Fuse Q|K|V once.
    wqkv = jnp.concatenate(
        [params["Wq"].T, params["Wk"].T, params["Wv"].T], axis=1).astype(mm_dt)
    wo_t = params["Wo"].T.astype(mm_dt)

    # head indicator S (d, H) and its [q|k] block-diagonal version S2 (2d, 2H)
    head_of = jnp.arange(d, dtype=jnp.int32) // hd
    S = (head_of[:, None] == jnp.arange(H, dtype=jnp.int32)[None, :]
         ).astype(jnp.float32)
    S2 = jnp.zeros((2 * d, 2 * H), jnp.float32)
    S2 = S2.at[:d, :H].set(S).at[d:, H:].set(S)

    # block-diagonal same-head mask with per-head value scale folded in
    inv_scale = jnp.power(
        jnp.float32(C), -jax.nn.sigmoid(params["norm_const"].reshape(H))
    ).astype(jnp.float32)                                              # (H,)
    HM = ((head_of[:, None] == head_of[None, :]).astype(jnp.float32)
          * inv_scale[head_of][None, :])                               # (d, d)

    lengths = lengths.astype(jnp.int32).reshape(N)
    x_in = x.astype(mm_dt)

    def const(shape):
        return pl.BlockSpec(shape, lambda n, lens: (0,) * len(shape))

    grid_spec = pltpu.PrefetchScalarGridSpec(
        num_scalar_prefetch=1,
        grid=(N // b_blk,),
        in_specs=[
            pl.BlockSpec((b_blk, C, d), lambda n, lens: (n, 0, 0)),   # x rows
            const((d, 3 * d)),                                        # Wqkv^T
            const((d, d)),                                            # Wo^T
            const((2 * d, 2 * H)),                                    # S2
            const((d, d)),                                            # HM
        ],
        out_specs=pl.BlockSpec((b_blk, C, d), lambda n, lens: (n, 0, 0)),
    )

    return pl.pallas_call(
        _fused_cosine_attn_kernel,
        out_shape=jax.ShapeDtypeStruct((N, C, d), out_dtype),
        grid_spec=grid_spec,
        compiler_params=pltpu.CompilerParams(
            dimension_semantics=("parallel",),   # batch axis -> both TCs on v7x
        ),
    )(lengths, x_in, wqkv, wo_t, S2, HM)


# ---------------------------------------------------------------------------
# Pure-JAX reference mirroring the PyTorch semantics (for correctness check)
# ---------------------------------------------------------------------------
def reference_forward(params, x, mask):
    N, C, d = x.shape
    H = params["num_heads"]
    hd = d // H
    q = (x @ params["Wq"].T).reshape(N, C, H, hd).transpose(0, 2, 1, 3)
    k = (x @ params["Wk"].T).reshape(N, C, H, hd).transpose(0, 2, 1, 3)
    v = (x @ params["Wv"].T).reshape(N, C, H, hd).transpose(0, 2, 1, 3)

    def l2norm(t):
        return t / jnp.maximum(jnp.linalg.norm(t, axis=-1, keepdims=True), 1e-12)

    q = l2norm(q)
    k = l2norm(k)
    m = mask.astype(x.dtype)[:, None, :, None]          # (N,1,C,1)
    q = q * m
    k = k * m
    v = v / (jnp.float32(C) ** jax.nn.sigmoid(params["norm_const"]))
    attn = q @ (jnp.swapaxes(k, -1, -2) @ v)            # (N,H,C,hd)
    attn = attn.transpose(0, 2, 1, 3).reshape(N, C, d)
    return attn @ params["Wo"].T


# ---------------------------------------------------------------------------
if __name__ == "__main__":
    N, C, d, H = 2, 16, 64, 8   # batch=2, seq=16, dim=64, heads=8 -> head_dim=8

    key = jax.random.PRNGKey(0)
    kq, kk, kv_, ko, kx = jax.random.split(key, 5)
    bound = 1.0 / (d ** 0.5)    # nn.Linear default init range
    params = {
        "Wq": jax.random.uniform(kq, (d, d), jnp.float32, -bound, bound),
        "Wk": jax.random.uniform(kk, (d, d), jnp.float32, -bound, bound),
        "Wv": jax.random.uniform(kv_, (d, d), jnp.float32, -bound, bound),
        "Wo": jax.random.uniform(ko, (d, d), jnp.float32, -bound, bound),
        "norm_const": 0.5 * jnp.ones((1, H, 1, 1), jnp.float32),
        "num_heads": H,
    }

    x = jax.random.normal(kx, (N, C, d), jnp.float32)
    lengths = jnp.array([C, C - 4], dtype=jnp.int32)
    mask = jnp.arange(C)[None, :] < lengths[:, None]     # (N, C) bool

    ref = reference_forward(params, x, mask)

    # Auto b_blk (=1 here -> 2 parallel grid steps, one per v7x TensorCore).
    out = jax.block_until_ready(attention_forward(params, x, lengths))
    assert out.shape == (N, C, d)
    assert jnp.allclose(out, ref, atol=1e-3, rtol=1e-3), "mismatch (b_blk auto)"

    # Also exercise the multi-rows-per-step path (b_blk=2 -> one grid step).
    out2 = jax.block_until_ready(attention_forward(params, x, lengths, b_blk=2))
    assert jnp.allclose(out2, ref, atol=1e-3, rtol=1e-3), "mismatch (b_blk=2)"

    print("KERNEL_OK")
</pallas_src>

<mosaic_0001>
module attributes {stable_mosaic.version = 11 : i64} {
  func.func @_fused_cosine_attn_kernel(%arg0: i32, %arg1: memref<2xi32, #tpu.memory_space<smem>>, %arg2: memref<1x16x64xf32, #tpu.memory_space<vmem>>, %arg3: memref<64x192xf32, #tpu.memory_space<vmem>>, %arg4: memref<64x64xf32, #tpu.memory_space<vmem>>, %arg5: memref<128x16xf32, #tpu.memory_space<vmem>>, %arg6: memref<64x64xf32, #tpu.memory_space<vmem>>, %arg7: memref<1x16x64xf32, #tpu.memory_space<vmem>>) attributes {dimension_semantics = [#tpu.dimension_semantics<parallel>], iteration_bounds = array<i64: 2>, scalar_prefetch = 1 : i64, scratch_operands = 0 : i64, tpu.core_type = #tpu.core_type<tc>, window_params = [{transform_indices = @transform_0, window_bounds = array<i64: 1, 16, 64>}, {pipeline_mode = #tpu.pipeline_mode<synchronous>, transform_indices = @transform_1, window_bounds = array<i64: 64, 192>}, {pipeline_mode = #tpu.pipeline_mode<synchronous>, transform_indices = @transform_2, window_bounds = array<i64: 64, 64>}, {pipeline_mode = #tpu.pipeline_mode<synchronous>, transform_indices = @transform_3, window_bounds = array<i64: 128, 16>}, {pipeline_mode = #tpu.pipeline_mode<synchronous>, transform_indices = @transform_4, window_bounds = array<i64: 64, 64>}, {transform_indices = @transform_5, window_bounds = array<i64: 1, 16, 64>}]} {
    %c0 = arith.constant 0 : index
    %c0_0 = arith.constant 0 : index
    %c0_1 = arith.constant 0 : index
    %0 = vector.load %arg2[%c0, %c0_0, %c0_1] : memref<1x16x64xf32, #tpu.memory_space<vmem>>, vector<1x16x64xf32>
    %1 = vector.shape_cast %0 : vector<1x16x64xf32> to vector<16x64xf32>
    %c0_2 = arith.constant 0 : index
    %c0_3 = arith.constant 0 : index
    %2 = vector.load %arg3[%c0_2, %c0_3] : memref<64x192xf32, #tpu.memory_space<vmem>>, vector<64x192xf32>
    %cst = arith.constant dense<0.000000e+00> : vector<16x192xf32>
    %3 = tpu.matmul %1, %2, %cst {dimension_numbers = #tpu.dot_dimension_numbers<[1], [0], [0], [1], [0, 0, 1, 1], [], []>} : vector<16x64xf32>, vector<64x192xf32>, vector<16x192xf32> -> vector<16x192xf32>
    %c1_i32 = arith.constant 1 : i32
    %4 = arith.muli %arg0, %c1_i32 : i32
    %5 = tpu.iota {dimensions = array<i32: 1>} : vector<1x16x1xi32>
    %6 = arith.index_cast %4 : i32 to index
    %7 = memref.load %arg1[%6] : memref<2xi32, #tpu.memory_space<smem>>
    %8 = vector.broadcast %7 : i32 to vector<1x16x1xi32>
    %9 = arith.cmpi slt, %5, %8 : vector<1x16x1xi32>
    %10 = arith.extui %9 : vector<1x16x1xi1> to vector<1x16x1xi32>
    %11 = arith.sitofp %10 : vector<1x16x1xi32> to vector<1x16x1xf32>
    %12 = vector.shape_cast %11 : vector<1x16x1xf32> to vector<16x1xf32>
    %13 = vector.extract_strided_slice %3 {offsets = [0, 0], sizes = [16, 128], strides = [1, 1]} : vector<16x192xf32> to vector<16x128xf32>
    %c0_4 = arith.constant 0 : index
    %c0_5 = arith.constant 0 : index
    %14 = vector.load %arg5[%c0_4, %c0_5] : memref<128x16xf32, #tpu.memory_space<vmem>>, vector<128x16xf32>
    %15 = arith.mulf %13, %13 : vector<16x128xf32>
    %cst_6 = arith.constant dense<0.000000e+00> : vector<16x16xf32>
    %16 = tpu.matmul %15, %14, %cst_6 {dimension_numbers = #tpu.dot_dimension_numbers<[1], [0], [0], [1], [0, 0, 1, 1], [], []>} : vector<16x128xf32>, vector<128x16xf32>, vector<16x16xf32> -> vector<16x16xf32>
    %cst_7 = arith.constant 1.000000e-24 : f32
    %17 = vector.broadcast %cst_7 : f32 to vector<16x16xf32>
    %18 = arith.maximumf %16, %17 : vector<16x16xf32>
    %19 = math.rsqrt %18 : vector<16x16xf32>
    %20 = vector.broadcast %12 : vector<16x1xf32> to vector<16x16xf32>
    %21 = arith.mulf %19, %20 : vector<16x16xf32>
    %cst_8 = arith.constant dense<0.000000e+00> : vector<16x128xf32>
    %22 = tpu.matmul %21, %14, %cst_8 {dimension_numbers = #tpu.dot_dimension_numbers<[1], [1], [0], [0], [0, 0, 1, 0], [], []>} : vector<16x16xf32>, vector<128x16xf32>, vector<16x128xf32> -> vector<16x128xf32>
    %23 = arith.mulf %13, %22 : vector<16x128xf32>
    %24 = vector.extract_strided_slice %23 {offsets = [0, 0], sizes = [16, 64], strides = [1, 1]} : vector<16x128xf32> to vector<16x64xf32>
    %25 = vector.shape_cast %24 : vector<16x64xf32> to vector<1x16x64xf32>
    %26 = vector.extract_strided_slice %23 {offsets = [0, 64], sizes = [16, 64], strides = [1, 1]} : vector<16x128xf32> to vector<16x64xf32>
    %27 = vector.shape_cast %26 : vector<16x64xf32> to vector<1x16x64xf32>
    %28 = vector.extract_strided_slice %3 {offsets = [0, 128], sizes = [16, 64], strides = [1, 1]} : vector<16x192xf32> to vector<16x64xf32>
    %29 = vector.shape_cast %28 : vector<16x64xf32> to vector<1x16x64xf32>
    "tpu.trace_start"() <{level = 10 : i32, message = "bci,bcj->bij"}> : () -> ()
    %cst_9 = arith.constant dense<0.000000e+00> : vector<1x64x64xf32>
    %30 = tpu.matmul %27, %29, %cst_9 {dimension_numbers = #tpu.dot_dimension_numbers<[1], [1], [2], [2], [0, 0, 0, 2, 1, 2], [0], [0]>} : vector<1x16x64xf32>, vector<1x16x64xf32>, vector<1x64x64xf32> -> vector<1x64x64xf32>
    "tpu.trace_stop"() : () -> ()
    %c0_10 = arith.constant 0 : index
    %c0_11 = arith.constant 0 : index
    %31 = vector.load %arg6[%c0_10, %c0_11] : memref<64x64xf32, #tpu.memory_space<vmem>>, vector<64x64xf32>
    %32 = vector.shape_cast %31 : vector<64x64xf32> to vector<1x64x64xf32>
    %33 = arith.mulf %30, %32 : vector<1x64x64xf32>
    "tpu.trace_start"() <{level = 10 : i32, message = "bci,bij->bcj"}> : () -> ()
    %cst_12 = arith.constant dense<0.000000e+00> : vector<1x16x64xf32>
    %34 = tpu.matmul %25, %33, %cst_12 {dimension_numbers = #tpu.dot_dimension_numbers<[2], [1], [1], [2], [0, 0, 0, 1, 1, 2], [0], [0]>} : vector<1x16x64xf32>, vector<1x64x64xf32>, vector<1x16x64xf32> -> vector<1x16x64xf32>
    "tpu.trace_stop"() : () -> ()
    %35 = vector.shape_cast %34 : vector<1x16x64xf32> to vector<16x64xf32>
    %c0_13 = arith.constant 0 : index
    %c0_14 = arith.constant 0 : index
    %36 = vector.load %arg4[%c0_13, %c0_14] : memref<64x64xf32, #tpu.memory_space<vmem>>, vector<64x64xf32>
    %cst_15 = arith.constant dense<0.000000e+00> : vector<16x64xf32>
    %37 = tpu.matmul %35, %36, %cst_15 {dimension_numbers = #tpu.dot_dimension_numbers<[1], [0], [0], [1], [0, 0, 1, 1], [], []>} : vector<16x64xf32>, vector<64x64xf32>, vector<16x64xf32> -> vector<16x64xf32>
    %38 = vector.shape_cast %37 : vector<16x64xf32> to vector<1x16x64xf32>
    %c0_16 = arith.constant 0 : index
    %c0_17 = arith.constant 0 : index
    %c0_18 = arith.constant 0 : index
    %39 = vector.load %arg7[%c0_16, %c0_17, %c0_18] : memref<1x16x64xf32, #tpu.memory_space<vmem>>, vector<1x16x64xf32>
    tpu.vector_store %arg7[%c0_16, %c0_17, %c0_18], %38 {strides = array<i32>} : memref<1x16x64xf32, #tpu.memory_space<vmem>>, vector<1x16x64xf32>,
    return
  }
  func.func @transform_0(%arg0: i32, %arg1: memref<2xi32, #tpu.memory_space<smem>>) -> (i32, i32, i32) {
    %c0_i32 = arith.constant 0 : i32
    %c0_i32_0 = arith.constant 0 : i32
    %c0_i32_1 = arith.constant 0 : i32
    return %arg0, %c0_i32, %c0_i32_0 : i32, i32, i32
  }
  func.func @transform_1(%arg0: i32, %arg1: memref<2xi32, #tpu.memory_space<smem>>) -> (i32, i32) {
    %c0_i32 = arith.constant 0 : i32
    %c0_i32_0 = arith.constant 0 : i32
    %c0_i32_1 = arith.constant 0 : i32
    return %c0_i32, %c0_i32_0 : i32, i32
  }
  func.func @transform_2(%arg0: i32, %arg1: memref<2xi32, #tpu.memory_space<smem>>) -> (i32, i32) {
    %c0_i32 = arith.constant 0 : i32
    %c0_i32_0 = arith.constant 0 : i32
    %c0_i32_1 = arith.constant 0 : i32
    return %c0_i32, %c0_i32_0 : i32, i32
  }
  func.func @transform_3(%arg0: i32, %arg1: memref<2xi32, #tpu.memory_space<smem>>) -> (i32, i32) {
    %c0_i32 = arith.constant 0 : i32
    %c0_i32_0 = arith.constant 0 : i32
    %c0_i32_1 = arith.constant 0 : i32
    return %c0_i32, %c0_i32_0 : i32, i32
  }
  func.func @transform_4(%arg0: i32, %arg1: memref<2xi32, #tpu.memory_space<smem>>) -> (i32, i32) {
    %c0_i32 = arith.constant 0 : i32
    %c0_i32_0 = arith.constant 0 : i32
    %c0_i32_1 = arith.constant 0 : i32
    return %c0_i32, %c0_i32_0 : i32, i32
  }
  func.func @transform_5(%arg0: i32, %arg1: memref<2xi32, #tpu.memory_space<smem>>) -> (i32, i32, i32) {
    %c0_i32 = arith.constant 0 : i32
    %c0_i32_0 = arith.constant 0 : i32
    %c0_i32_1 = arith.constant 0 : i32
    return %arg0, %c0_i32, %c0_i32_0 : i32, i32, i32
  }
}

</mosaic_0001>

<bundles_post_ra>
// kernel: tpu_custom_call.1
= control target key start
LH: loop header
LB: loop body
LE: loop exit
PB: predicated region body
PF: predicated region fallthrough
CT: control target
= control target key end

     0   :  { %s2171_s0 = inlined_call_operand.vmem [shape: s32[2], index: 0, kind: input, shape index: {}]   ;;  %s2172_s1 = inlined_call_operand.hbm [shape: f32[2,16,64], index: 1, kind: input, shape index: {}]   ;;  %s2173_s2 = inlined_call_operand.vmem [shape: f32[64,192], index: 2, kind: input, shape index: {}]   ;;  %s2174_s3 = inlined_call_operand.hbm [shape: f32[64,64], index: 3, kind: input, shape index: {}]   ;;  %s2175_s4 = inlined_call_operand.vmem [shape: f32[128,16], index: 4, kind: input, shape index: {}]   ;;  %s2176_s5 = inlined_call_operand.hbm [shape: f32[64,64], index: 5, kind: input, shape index: {}]   ;;  %s2177_s6 = inlined_call_operand.hbm [shape: f32[2,16,64], index: 6, kind: output, shape index: {}]  }
   0x1   :  { %s11_s23 = sshll.u32 %s2171_s0, 4  ;;  %s12_s23 = int_to_ptr.vmem [resolvable:$true] %s11_s23 }
   0x2   :  { %s1538_s24 = scalar_lea.vmem %s12_s23, 16  ;;  %p1543_p1 = scmp.lt.s32.totalorder %s12_s23, %s12_s23 }
   0x3   :  { %p1539_p0 = scmp.ne.s32.totalorder %s12_s23, %s1538_s24  ;;  %p1544_p2 = scmp.lt.s32.totalorder %s1538_s24, %s1538_s24 }
   0x5   :  { %p1545_p3 = por %p1544_p2, %p1543_p1 }
   0x7   :  { %p1546_p4 = pnand %p1545_p3, %p1539_p0 }
   0x9   :  { %1549 = shalt.err (!%p1546_p4)  }
   0xa   :  { %s1710_s25 = smov [#allocation3]  }
   0xb   :  { %14 = dma.vmem_to_smem %s12_s23, 16, %s1710_s25, [#allocation2] }
   0xc   :  { %1680 = dma.done.wait [#allocation2], 16 }
   0xd   :  { %1681 = vsyncadd [#allocation2], 4294967280 }
   0xe   :  { %16 = sfence }
   0xf   :  { %17 = vsyncpa [#allocation5], 0 }
  0x10   :  { %19 = vsyncpa [#allocation5 + $0x1], 0 }
  0x11   :  { %20 = vsyncpa [#allocation8], 0 }
  0x12   :  { %21 = vsyncpa [#allocation6], 0 }
  0x13   :  { %23 = vsyncpa [#allocation6 + $0x1], 0  ;;  %s1759_s26 = smov 0   ;;  %s1761_s0 = smov 0  }
  0x14   :  { %s1763_s27 = smov 0   ;;  %s1765_s28 = smov 0  }
  0x15 LB: > { %s1780_s29 = sadd.s32 4294967295, %s1708_s28   ;;  %s1084_s30 = sadd.s32 4294967294, %s1708_s28   ;;  %s1708_s28 = sphi %s1765_s28, %s2199_s28   ;;  %s1704_s27 = sphi %s1763_s27, %s2198_s27   ;;  %s1700_s0 = sphi %s1761_s0, %s2197_s0   ;;  %s1696_s26 = sphi %s1759_s26, %s2196_s26  }
  0x16   : > { %p49_p5 = scmp.ne.s32.totalorder %s1700_s0, %s1696_s26  ;;  %p2178_p6 = scmp.eq.s32.totalorder %s1780_s29, 0 }
  0x17   : > { %p163_p8 = scmp.eq.s32.totalorder %s1084_s30, 1  ;;  %p1085_p10 = scmp.ge.s32.totalorder %s1708_s28, 1 }
  0x18   : > { %p1789_p9 = por %p2178_p6, %p49_p5  ;;  %p170_p12 = scmp.lt.s32.totalorder %s1708_s28, 3 }
  0x19   : > { %p1794_p11 = por %p163_p8, %p49_p5  ;;  %s1711_s10 = smov [#allocation7]  }
  0x1a   : > { %s2181_s7 = scalar_select %p1789_p9, 1, 0 }
  0x1b   : > { %s2182_s8 = scalar_select %p1794_p11, 1, 0 }
  0x1c   : > { %p1799_p13 = pnand %p1085_p10, %p170_p12  ;;  %s185_s11 = sshll.u32 %s1711_s10, 4  ;;  %s1803_s11 = int_to_ptr.vmem [resolvable:$true] %s185_s11 }
  0x1d   : > { %s1712_s13 = smov [#allocation9]   ;;  %s1550_s17 = scalar_lea.hbm %s2174_s3, 1024 }
  0x1e   : > { %p1472_p0 = pneg %p1799_p13  ;;  %s201_s14 = sshll.u32 %s1712_s13, 4  ;;  %s1814_s14 = int_to_ptr.vmem [resolvable:$true] %s201_s14 }
  0x1f   : > { %p1551_p3 = scmp.ne.s32.totalorder %s2174_s3, %s1550_s17  ;;  %p1557_p10 = scmp.lt.u32.totalorder %s1550_s17, %s2174_s3 }
  0x20   : > { %p1810_p2 = pnand %p1472_p0, %p2178_p6 }
  0x22   : > { %p1552_p4 = pneg %p1810_p2 }
  0x24   : > { %p1553_p5 = pnand %p1552_p4, %p1551_p3 }
  0x26   : > { %p1554_p8 = pneg %p1553_p5 }
  0x28   : > { %p1559_p12 = pnand %p1557_p10, %p1554_p8 }
  0x2a   : > { %1562 = shalt.err (!%p1559_p12)
}
  0x2b   : > { %s1563_s22 = scalar_lea.vmem %s1803_s11, 1024  ;;  %p1571_p7 = scmp.lt.s32.totalorder %s1803_s11, %s1803_s11 }
  0x2c   : > { %p1564_p0 = scmp.ne.s32.totalorder %s1803_s11, %s1563_s22  ;;  %p1572_p3 = scmp.lt.s32.totalorder %s1563_s22, %s1563_s22 }
  0x2e   : > { %p1566_p1 = pnand %p1564_p0, %p1552_p4  ;;  %p1573_p5 = por %p1572_p3, %p1571_p7 }
  0x30   : > { %p1567_p6 = pneg %p1566_p1 }
  0x32   : > { %p1574_p11 = pnand %p1573_p5, %p1567_p6 }
  0x34   : > { %1577 = shalt.err (!%p1574_p11)
}
  0x35   : > { %s1713_s23 = smov 128   ;;  %s1714_s24 = smov 8  }
  0x36   : > { %1475 = dma.hbm_to_vmem [thread:$0]  (!%p1810_p2), %s2174_s3, 1024, %s1803_s11, [#allocation8], %s1713_s23, %s1713_s23, %s1714_s24  }
  0x37   : > { %s1578_s15 = scalar_lea.hbm %s2176_s5, 1024 }
  0x38   : > { %p1579_p6 = scmp.ne.s32.totalorder %s2176_s5, %s1578_s15  ;;  %p1585_p1 = scmp.lt.u32.totalorder %s1578_s15, %s2176_s5 }
  0x3a   : > { %p1581_p7 = pnand %p1579_p6, %p1552_p4 }
  0x3c   : > { %p1582_p11 = pneg %p1581_p7 }
  0x3e   : > { %p1587_p8 = pnand %p1585_p1, %p1582_p11 }
  0x40   : > { %1590 = shalt.err (!%p1587_p8)
}
  0x41   : > { %s1591_s11 = scalar_lea.vmem %s1814_s14, 1024  ;;  %p1599_p3 = scmp.lt.s32.totalorder %s1814_s14, %s1814_s14 }
  0x42   : > { %p1592_p10 = scmp.ne.s32.totalorder %s1814_s14, %s1591_s11  ;;  %p1600_p5 = scmp.lt.s32.totalorder %s1591_s11, %s1591_s11 }
  0x44   : > { %p1594_p12 = pnand %p1592_p10, %p1552_p4  ;;  %p1601_p6 = por %p1600_p5, %p1599_p3 }
  0x46   : > { %p1595_p0 = pneg %p1594_p12 }
  0x48   : > { %p1602_p7 = pnand %p1601_p6, %p1595_p0 }
  0x4a   : > { %1605 = shalt.err (!%p1602_p7)
}
  0x4b   : > { %1478 = dma.hbm_to_vmem [thread:$0]  (!%p1810_p2), %s2176_s5, 1024, %s1814_s14, [#allocation8], %s1713_s23, %s1713_s23, %s1714_s24  }
  0x4c   : > { %s1875_s12 = sadd.s32 1, %s1708_s28   ;;  %s36_s22 = sadd.s32 1, %s1704_s27 }
  0x4d   : > { %s33_s25 = ssub.s32 %s1708_s28, %s1875_s12  ;;  %p43_p4 = scmp.ne.s32.totalorder %s1704_s27, %s1700_s0 }
  0x4e   : > { %p34_p11 = scmp.eq.s32.totalorder %s33_s25, 0  ;;  %p44_p1 = scmp.eq.s32.totalorder %s1708_s28, 0 }
  0x4f   : > { %p2185_p8 = scmp.eq.s32.totalorder %s1780_s29, 1  ;;  %p1489_p12 = scmp.lt.s32.totalorder %s1708_s28, 2 }
  0x50   : > { %s1891_s10 = scalar_select %p34_p11, %s1704_s27, %s36_s22  }
  0x51   : > { %p1885_p10 = por %p2185_p8, %p43_p4  ;;  %p45_p0 = por %p44_p1, %p43_p4 }
  0x52   : > { %s215_s13 = sand.u32 1, %s1704_s27   ;;  %s1136_s14 = sshll.u32 %s1708_s28, 8 }
  0x53   : > { %s2186_s30 = scalar_select %p1885_p10, 1, 0 }
  0x54   : > { %s1089_s15 = sshll.u32 %s215_s13, 4  ;;  %s1898_s18 = scalar_lea.hbm %s2172_s1, %s1136_s14 }
  0x55   : > { %s219_s19 = scalar_lea.vmem [#allocation4], %s1089_s15  ;;  %p1902_p2 = pnand %p1489_p12, %p45_p0 }
  0x56   : > { %s226_s11 = sshll.u32 %s219_s19, 4  ;;  %s1906_s21 = scalar_lea.sflag [#allocation5], %s215_s13  ;;  %s1900_s11 = int_to_ptr.vmem [resolvable:$true] %s226_s11 }
  0x57   : > { %s1606_s22 = scalar_lea.hbm %s1898_s18, 256  ;;  %p1608_p5 = pneg %p1902_p2 }
  0x58   : > { %p1607_p3 = scmp.ne.s32.totalorder %s1898_s18, %s1606_s22  ;;  %s1611_s14 = scalar_lea.hbm %s2172_s1, 512 }
  0x59   : > { %p1612_p4 = scmp.lt.u32.totalorder %s1898_s18, %s2172_s1  ;;  %p1613_p11 = scmp.lt.u32.totalorder %s1611_s14, %s1606_s22 }
  0x5a   : > { %p1609_p6 = pnand %p1608_p5, %p1607_p3  ;;  %p1615_p8 = scmp.lt.u32.totalorder %s1606_s22, %s1898_s18 }
  0x5b   : > { %p1614_p1 = por %p1613_p11, %p1612_p4 }
  0x5c   : > { %p1610_p7 = pneg %p1609_p6 }
  0x5d   : > { %p1616_p12 = por %p1615_p8, %p1614_p1 }
  0x5f   : > { %p1617_p0 = pnand %p1616_p12, %p1610_p7 }
  0x61   : > { %1620 = shalt.err (!%p1617_p0)
}
  0x62   : > { %s1621_s13 = scalar_lea.vmem %s1900_s11, 256  ;;  %s1715_s19 = smov [#allocation4]  }
  0x63   : > { %p1622_p3 = scmp.ne.s32.totalorder %s1900_s11, %s1621_s13  ;;  %s1626_s25 = sshll.u32 %s1715_s19, 4  ;;  %s1627_s25 = int_to_ptr.vmem [resolvable:$false] %s1626_s25 }
  0x64   : > { %s1628_s15 = scalar_lea.vmem %s1627_s25, 512  ;;  %p1629_p9 = scmp.lt.s32.totalorder %s1900_s11, %s1627_s25 }
  0x65   : > { %p1624_p6 = pnand %p1622_p3, %p1608_p5  ;;  %p1630_p4 = scmp.lt.s32.totalorder %s1628_s15, %s1621_s13 }
  0x67   : > { %p1625_p10 = pneg %p1624_p6  ;;  %p1631_p11 = por %p1630_p4, %p1629_p9 }
  0x69   : > { %p1632_p1 = pnand %p1631_p11, %p1625_p10 }
  0x6b   : > { %1635 = shalt.err (!%p1632_p1)
}
  0x6c   : > { %1482 = dma.hbm_to_vmem [thread:$0]  (!%p1902_p2), %s1898_s18, 256, %s1900_s11, %s1906_s21, %s1713_s23, %s1713_s23, %s1714_s24  }
  0x6d   : > { %238 = sbr.rel (%p1799_p13) target bundleno = 1736 (0x6c8), region = 40  ;;  %s1940_s22 = sand.u32 (!%p1799_p13), 1, %s1700_s0  }
  0x6e   : > { %s1093_s14 = sshll.u32 (!%p1799_p13), %s1940_s22, 4  ;;  %s241_s16 = scalar_lea.sflag (!%p1799_p13), [#allocation5], %s1940_s22 }
  0x6f   : > { %s1946_s20 = scalar_lea.vmem (!%p1799_p13), [#allocation4], %s1093_s14  ;;  %p2188_p9 = scmp.ne.s32.totalorder (!%p1799_p13), %s2181_s7, 0 }
  0x74   : > { %1683 = dma.done.wait (%p2188_p9), %s241_s16, 256  }
  0x75   : > { %1685 = vsyncadd (%p2188_p9), %s241_s16, 4294967040  ;;  %p2189_p10 = scmp.eq.s32.totalorder %s1780_s29, 0 }
  0x77   : > { %1687 = dma.done.wait (%p2189_p10), [#allocation8], 2048   ;;  %p2190_p13 = pmov %p2189_p10 }
  0x78   : > { %v1716_v0 = vmov 0.0   ;;  %v282_v1 = vld [vmem:[%s2173_s2 + $0x8] sm:$0xff]  ;;  %v284_v2 = vld [vmem:[%s2173_s2 + $0x18] sm:$0xff]  ;;  %v281_v3 = vld [vmem:[%s2173_s2] sm:$0xff]  ;;  %vm297_vm0 = vcmask 523264   ;;  %vm491_vm1 = vcmask 130048   ;;  %v381_v59 = vlaneseq }
  0x79   : > { %1689 = vsyncadd (%p2190_p13), [#allocation8], 4294965248  ;;  %368 = vmatprep.mubr.f32.mxu0 %v1716_v0  ;;  %v1328_v4 = vpack.c.bf16 %v284_v2, %v282_v1  ;;  %v283_v5 = vld [vmem:[%s2173_s2 + $0x10] sm:$0xff]  ;;  %v286_v6 = vld [vmem:[%s2173_s2 + $0x28] sm:$0xff]  ;;  %s384_s15 = sld [smem:[#allocation3 + %s1780_s29]]  ;;  %s1717_s16 = smov 64  }
  0x7a   : > { %v288_v7 = vld [vmem:[%s2173_s2 + $0x38] sm:$0xff]  ;;  %v1330_v8 = vpack.c.bf16 %v283_v5, %v281_v3  ;;  %v285_v10 = vld [vmem:[%s2173_s2 + $0x20] sm:$0xff]  ;;  %v287_v11 = vld [vmem:[%s2173_s2 + $0x30] sm:$0xff]  ;;  %v382_v60 = vshrl.u32 %v381_v59, 7  ;;  %s278_s9 = scalar_lea.vmem [#allocation10], %s1093_s14  ;;  %s1137_s24 = sshll.u32 %s1780_s29, 8 }
  0x7b   : > { %v1332_v9 = vpack.c.bf16 %v288_v7, %v286_v6  ;;  %v290_v12 = vld [vmem:[%s2173_s2 + $0x48] sm:$0xff]  ;;  %1329 = vmatprep.subr.bf16.mxu0 %v1328_v4  ;;  %v292_v13 = vld [vmem:[%s2173_s2 + $0x58] sm:$0xff]  ;;  %v1334_v14 = vpack.c.bf16 %v287_v11, %v285_v10  ;;  %v289_v15 = vld [vmem:[%s2173_s2 + $0x40] sm:$0xff]  ;;  %s992_s23 = sshll.u32 %s278_s9, 4  ;;  %s2125_s7 = scalar_lea.hbm %s2177_s6, %s1137_s24  ;;  %s2120_s23 = int_to_ptr.vmem [resolvable:$true] %s992_s23 }
  0x7c   : > { %1331 = vmatpush1.bf16.msra.mxu0 %v1330_v8  ;;  %v1336_v16 = vpack.c.bf16 %v292_v13, %v290_v12  ;;  %v291_v17 = vld [vmem:[%s2173_s2 + $0x50] sm:$0xff]  ;;  %v294_v18 = vld [vmem:[%s2173_s2 + $0x68] sm:$0xff]  ;;  %v296_v19 = vld [vmem:[%s2173_s2 + $0x78] sm:$0xff]  ;;  %v383_v2 = vadd.s32 8, %v382_v60  ;;  %s979_s21 = scalar_lea.sflag [#allocation6], %s1940_s22  ;;  %s1636_s14 = scalar_lea.vmem %s2120_s23, 256 }
  0x7d   : > { %1333 = vmatprep.subr.bf16.mxu0 %v1332_v9  ;;  %v392_v20 = vld [vmem:[%s2175_s4] sm:$0xff]  ;;  %v393_v21 = vld [vmem:[%s2175_s4 + $0x8] sm:$0xff]  ;;  %v394_v22 = vld [vmem:[%s2175_s4 + $0x10] sm:$0xff]  ;;  %v1338_v25 = vpack.c.bf16 %v291_v17, %v289_v15  ;;  %v1340_v29 = vpack.c.bf16 %v296_v19, %v294_v18  ;;  %p1637_p2 = scmp.ne.s32.totalorder %s2120_s23, %s1636_s14  ;;  %p2193_p5 = scmp.ne.s32.totalorder %s2186_s30, 0 }
  0x7e   : > { %v1344_v23 = vpack.c.bf16 %v393_v21, %v392_v20  ;;  %v395_v24 = vld [vmem:[%s2175_s4 + $0x18] sm:$0xff]  ;;  %v396_v27 = vld [vmem:[%s2175_s4 + $0x20] sm:$0xff]  ;;  %v397_v28 = vld [vmem:[%s2175_s4 + $0x28] sm:$0xff]  ;;  %s1718_s29 = smov [#allocation10]  }
  0x7f   : > { %v1348_v26 = vpack.c.bf16 %v395_v24, %v394_v22  ;;  %v293_v30 = vld [vmem:[%s2173_s2 + $0x60] sm:$0xff]  ;;  %v295_v31 = vld [vmem:[%s2173_s2 + $0x70] sm:$0xff]  ;;  %v1352_v32 = vpack.c.bf16 %v397_v28, %v396_v27  ;;  %v399_v35 = vld [vmem:[%s2175_s4 + $0x38] sm:$0xff]  ;;  %v385_v3 = vstv %s384_s15  ;;  %p1638_p7 = pnand %p1637_p2, %p2193_p5  ;;  %s1640_s17 = sshll.u32 %s1718_s29, 4  ;;  %s1641_s17 = int_to_ptr.vmem [resolvable:$false] %s1640_s17 }
  0x80   : > { %1335 = vmatpush1.bf16.msra.mxu0 %v1334_v14  ;;  %1345 = vmatprep.subr.bf16.mxu1 %v1344_v23  ;;  %v1342_v33 = vpack.c.bf16 %v295_v31, %v293_v30  ;;  %v398_v34 = vld [vmem:[%s2175_s4 + $0x30] sm:$0xff]  ;;  %v400_v38 = vld [vmem:[%s2175_s4 + $0x40] sm:$0xff]  ;;  %v401_v39 = vld [vmem:[%s2175_s4 + $0x48] sm:$0xff]  ;;  %vm387_vm3 = vcmp.lt.s32.totalorder %v383_v2, %v385_v3  ;;  %vm386_vm4 = vcmp.lt.s32.totalorder %v382_v60, %v385_v3  ;;  %p1643_p12 = scmp.lt.s32.totalorder %s2120_s23, %s1641_s17 }
  0x81   : > { %1337 = vmatprep.subr.bf16.mxu0 %v1336_v16  ;;  %1347 = vmatpush3.bf16.msra.mxu1 %v1344_v23  ;;  %v1356_v36 = vpack.c.bf16 %v399_v35, %v398_v34  ;;  %v279_v37 = vld [vmem:[%s1946_s20] sm:$0xff]  ;;  %v1360_v40 = vpack.c.bf16 %v401_v39, %v400_v38  ;;  %v280_v41 = vld [vmem:[%s1946_s20 + $0x8] sm:$0xff]  ;;  %vm2060_vm2 = vmpackc.low %vm491_vm1, %vm491_vm1  ;;  %v1100_v4 = vsel %vm387_vm3, 1.0, %v1716_v0  ;;  %v1099_v5 = vsel %vm386_vm4, 1.0, %v1716_v0  ;;  %p1639_p8 = pneg %p1638_p7  ;;  %s1642_s20 = scalar_lea.vmem %s1641_s17, 512 }
  0x82   : > { %1349 = vmatprep.subr.bf16.mxu1 %v1348_v26  ;;  %v402_v42 = vld [vmem:[%s2175_s4 + $0x50] sm:$0xff]  ;;  %v403_v43 = vld [vmem:[%s2175_s4 + $0x58] sm:$0xff]  ;;  %v404_v45 = vld [vmem:[%s2175_s4 + $0x60] sm:$0xff]  ;;  %p1644_p0 = scmp.lt.s32.totalorder %s1642_s20, %s1636_s14 }
  0x83   : > { %v1364_v44 = vpack.c.bf16 %v403_v43, %v402_v42  ;;  %v405_v46 = vld [vmem:[%s2175_s4 + $0x68] sm:$0xff]  ;;  %v406_v48 = vld [vmem:[%s2175_s4 + $0x70] sm:$0xff]  ;;  %v407_v49 = vld [vmem:[%s2175_s4 + $0x78] sm:$0xff] }
  0x84   : > { %1339 = vmatpush1.bf16.msra.mxu0 %v1338_v25  ;;  %v1368_v47 = vpack.c.bf16 %v405_v46, %v404_v45  ;;  %v1372_v50 = vpack.c.bf16 %v407_v49, %v406_v48  ;;  %v792_v24 = vld [vmem:[#allocation9] sm:$0xff]  ;;  %v795_v30 = vld [vmem:[#allocation9 + $0x18] sm:$0xff]  ;;  %v794_v31 = vld [vmem:[#allocation9 + $0x10] sm:$0xff]  ;;  %p1645_p3 = por %p1644_p0, %p1643_p12 }
  0x85   : > { %1341 = vmatprep.subr.bf16.mxu0 %v1340_v29  ;;  %1351 = vmatpush3.bf16.msra.mxu1 %v1348_v26  ;;  %v796_v38 = vld [vmem:[#allocation9 + $0x20] sm:$0xff]  ;;  %v798_v45 = vld [vmem:[#allocation9 + $0x30] sm:$0xff] }
  0x86   : > { %1353 = vmatprep.subr.bf16.mxu1 %v1352_v32  ;;  %v887_v49 = vld [vmem:[#allocation7] sm:$0xff]  ;;  %v893_v60 = vld [vmem:[#allocation7 + $0x30] sm:$0xff]  ;;  %p1646_p6 = pnand %p1645_p3, %p1639_p8 }
  0x88   : > { %1343 = vmatpush1.bf16.msra.mxu0 %v1342_v33 }
  0x89   : > { %1355 = vmatpush3.bf16.msra.mxu1 %v1352_v32  ;;  %1378 = vmatprep.subr.msk.bf16.mxu0 %vm2060_vm2, %v1344_v23 }
  0x8a   : > { %1357 = vmatprep.subr.bf16.mxu1 %v1356_v36 }
  0x8b   : > { %1097 = vmatmul.mubr.msk.f32.vlgmr.msra.gmra.mrb[0].mxu0 %vm297_vm0, %v279_v37  ;;  %v797_v37 = vld [vmem:[#allocation9 + $0x28] sm:$0xff] }
  0x8c   : > { %374 = vmatprep.mubr.f32.mxu0 %v1716_v0 }
  0x8d   : > { %1359 = vmatpush3.bf16.msra.mxu1 %v1356_v36 }
  0x8e   : > { %1361 = vmatprep.subr.bf16.mxu1 %v1360_v40 }
  0x8f   : > { %1098 = vmatmul.mubr.msk.f32.gmra.mrb[2].mxu0 %vm297_vm0, %v280_v41 }
  0x91   : > { %1363 = vmatpush3.bf16.msra.mxu1 %v1360_v40  ;;  %1381 = vmatpush3.bf16.xpose.msk.msra.mxu0 %vm2060_vm2, %v1344_v23  ;;  %v793_v23 = vld [vmem:[#allocation9 + $0x8] sm:$0xff] }
  0x92   : > { %1365 = vmatprep.subr.bf16.mxu1 %v1364_v44  ;;  %1384 = vmatprep.subr.msk.bf16.mxu0 %vm2060_vm2, %v1348_v26 }
  0x95   : > { %1367 = vmatpush3.bf16.msra.mxu1 %v1364_v44 }
  0x96   : > { %1369 = vmatprep.subr.bf16.mxu1 %v1368_v47 }
  0x99   : > { %1371 = vmatpush3.bf16.msra.mxu1 %v1368_v47  ;;  %1387 = vmatpush3.bf16.xpose.msk.msra.mxu0 %vm2060_vm2, %v1348_v26 }
  0x9a   : > { %1373 = vmatprep.subr.bf16.mxu1 %v1372_v50  ;;  %1390 = vmatprep.subr.msk.bf16.mxu0 %vm2060_vm2, %v1352_v32 }
  0x9d   : > { %1375 = vmatpush3.bf16.msra.mxu1 %v1372_v50 }
  0xa1   : > { %1393 = vmatpush3.bf16.xpose.msk.msra.mxu0 %vm2060_vm2, %v1352_v32 }
  0xa2   : > { %1396 = vmatprep.subr.msk.bf16.mxu0 %vm2060_vm2, %v1356_v36 }
  0xa9   : > { %1399 = vmatpush3.bf16.xpose.msk.msra.mxu0 %vm2060_vm2, %v1356_v36 }
  0xaa   : > { %1402 = vmatprep.subr.msk.bf16.mxu0 %vm2060_vm2, %v1360_v40 }
  0xb1   : > { %1405 = vmatpush3.bf16.xpose.msk.msra.mxu0 %vm2060_vm2, %v1360_v40 }
  0xb2   : > { %1408 = vmatprep.subr.msk.bf16.mxu0 %vm2060_vm2, %v1364_v44 }
  0xb9   : > { %1411 = vmatpush3.bf16.xpose.msk.msra.mxu0 %vm2060_vm2, %v1364_v44  ;;  %v799_v44 = vld [vmem:[#allocation9 + $0x38] sm:$0xff] }
  0xba   : > { %1414 = vmatprep.subr.msk.bf16.mxu0 %vm2060_vm2, %v1368_v47 }
  0xc1   : > { %1417 = vmatpush3.bf16.xpose.msk.msra.mxu0 %vm2060_vm2, %v1368_v47 }
  0xc2   : > { %1420 = vmatprep.subr.msk.bf16.mxu0 %vm2060_vm2, %v1372_v50 }
  0xc9   : > { %1423 = vmatpush3.bf16.xpose.msk.msra.mxu0 %vm2060_vm2, %v1372_v50  ;;  %v888_v50 = vld [vmem:[#allocation7 + $0x8] sm:$0xff] }
 0x15e   : > { %v370_v52 = vpop.f32.mrb[0].mxu0 }
 0x15f   : > { %v372_v53 = vpop.f32.mrb[1].mxu0  ;;  %v408_v54 = vmul.f32 %v370_v52, %v370_v52 }
 0x161   : > { %1236 = vmatprep.mubr.f32.mxu1 %v408_v54  ;;  %v889_v54 = vld [vmem:[#allocation7 + $0x10] sm:$0xff] }
 0x162   : > { %v376_v55 = vpop.f32.mrb[2].mxu0 }
 0x163   : > { %v409_v56 = vmul.f32 %v376_v55, %v376_v55  ;;  %v378_v57 = vpop.f32.mrb[3].mxu0 }
 0x164   : > { %v1424_v58 = vpack.c.bf16 %v378_v57, %v372_v53  ;;  %v1444_v53 = vpack.c.bf16 %v888_v50, %v887_v49  ;;  %v891_v57 = vld [vmem:[#allocation7 + $0x20] sm:$0xff] }
 0x165   : > { %1237 = vmatmul.mubr.f32.vlgmr.msra.gmra.mrb[0].mxu1 %v409_v56 }
 0x166   : > { %1425 = vmatprep.subr.bf16.mxu1 %v1424_v58 }
 0x167   : > { %1427 = vmatpush3.bf16.msra.mxu1 %v1424_v58  ;;  %v892_v58 = vld [vmem:[#allocation7 + $0x28] sm:$0xff] }
 0x168   : > { %v1452_v59 = vpack.c.bf16 %v892_v58, %v891_v57 }
 0x238   : > { %v1238_v61 = vpop.f32.mrb[0].mxu1 }
 0x239   : > { %v486_v62 = vmax.f32 %v1238_v61, 1e-24  ;;  %v476_v63 = vpop.f32.mrb[1].mxu1  ;;  %v894_v61 = vld [vmem:[#allocation7 + $0x38] sm:$0xff] }
 0x23a   : > { %v485_v1 = vmax.f32 %v476_v63, 1e-24 }
 0x23b   : > { %1534 = vrsqrt.f32 %v486_v62  ;;  %v1456_v62 = vpack.c.bf16 %v894_v61, %v893_v60 }
 0x23c   : > { %1536 = vrsqrt.f32 %v485_v1 }
 0x245   : > { %v1535_v6 = vpop.eup %1534 }
 0x246   : > { %v1537_v7 = vpop.eup %1536  ;;  %v490_v8 = vmul.f32 %v1535_v6, %v1100_v4 }
 0x247   : > { %v489_v9 = vmul.f32 %v1537_v7, %v1099_v5 }
 0x249   : > { %1271 = vmatprep.mubr.msk.f32.mxu0 %vm491_vm1, %v489_v9 }
 0x24a   : > { %1272 = vmatmul.mubr.msk.f32.vlgmr.msra.gmra.mrb[4].mxu0 %vm491_vm1, %v490_v8 }
 0x31d   : > { %v1273_v10 = vpop.f32.mrb[4].mxu0 }
 0x31e   : > { %v2101_v11 = vmul.f32 %v1273_v10, %v376_v55  ;;  %v612_v12 = vpop.f32.mrb[5].mxu0  ;;  %v890_v55 = vld [vmem:[#allocation7 + $0x18] sm:$0xff] }
 0x31f   : > { %v621_v13 = vmul.f32 %v612_v12, %v370_v52  ;;  %v1448_v56 = vpack.c.bf16 %v890_v55, %v889_v54 }
 0x321   : > { %625 = vrot.lane.b32.xlu0 %v621_v13, %s1717_s16 }
 0x325   : > { %627 = vrot.lane.b32.xlu0 %v2101_v11, %s1717_s16 }
 0x393   : > { %v626_v14 = vpop.permute.xlu0 %625 }
 0x394   : > { %631 = vxpose.xlu1.b32.start [1/2] (short) (narrow) %v626_v14, 64 }
 0x397   : > { %v628_v0 = vpop.permute.xlu0 %627 }
 0x398   : > { %632 = vxpose.xlu1.b32.end [2/2] (short) (narrow) %v628_v0, 64 }
 0x414   : > { %v647_v15 = vpop.trf.xlu1 }
 0x415   : > { %1278 = vmatprep.mubr.msk.f32.mxu1 %vm491_vm1, %v647_v15 }
 0x418   : > { %v648_v16 = vpop.trf.xlu1 }
 0x419   : > { %1279 = vmatmul.mubr.msk.f32.vlgmr.msra.gmra.mrb[2].mxu1 %vm491_vm1, %v648_v16 }
 0x41c   : > { %v649_v17 = vpop.trf.xlu1 }
 0x41d   : > { %1281 = vmatprep.mubr.msk.f32.mxu1 %vm491_vm1, %v649_v17 }
 0x420   : > { %v650_v18 = vpop.trf.xlu1 }
 0x421   : > { %1282 = vmatmul.mubr.msk.f32.gmra.mrb[4].mxu1 %vm491_vm1, %v650_v18 }
 0x424   : > { %v651_v19 = vpop.trf.xlu1 }
 0x425   : > { %1284 = vmatprep.mubr.msk.f32.mxu1 %vm491_vm1, %v651_v19 }
 0x428   : > { %v652_v20 = vpop.trf.xlu1 }
 0x429   : > { %1285 = vmatmul.mubr.msk.f32.gmra.mrb[6].mxu1 %vm491_vm1, %v652_v20 }
 0x42c   : > { %v653_v21 = vpop.trf.xlu1 }
 0x42d   : > { %1287 = vmatprep.mubr.msk.f32.mxu1 %vm491_vm1, %v653_v21 }
 0x430   : > { %v654_v22 = vpop.trf.xlu1 }
 0x431   : > { %1288 = vmatmul.mubr.msk.f32.gmra.mrb[8].mxu1 %vm491_vm1, %v654_v22 }
 0x432   : > { %1306 = vmatprep.mubr.msk.f32.mxu1 %vm297_vm0, %v621_v13 }
 0x4ec   : > { %v1280_v25 = vpop.f32.mrb[2].mxu1 }
 0x4ed   : > { %v801_v26 = vmul.f32 %v1280_v25, %v793_v23  ;;  %v753_v27 = vpop.f32.mrb[3].mxu1 }
 0x4ee   : > { %v800_v28 = vmul.f32 %v792_v24, %v753_v27 }
 0x4f0   : > { %v1428_v29 = vpack.c.bf16 %v801_v26, %v800_v28 }
 0x4f2   : > { %1429 = vmatprep.subr.bf16.mxu1 %v1428_v29 }
 0x4f3   : > { %1431 = vmatpush3.bf16.msra.mxu1 %v1428_v29 }
 0x4f4   : > { %v1283_v32 = vpop.f32.mrb[4].mxu1 }
 0x4f5   : > { %v803_v33 = vmul.f32 %v1283_v32, %v795_v30  ;;  %v763_v34 = vpop.f32.mrb[5].mxu1 }
 0x4f6   : > { %v802_v35 = vmul.f32 %v794_v31, %v763_v34 }
 0x4f8   : > { %v1432_v36 = vpack.c.bf16 %v803_v33, %v802_v35 }
 0x4fa   : > { %1433 = vmatprep.subr.bf16.mxu1 %v1432_v36 }
 0x4fb   : > { %1435 = vmatpush3.bf16.msra.mxu1 %v1432_v36 }
 0x4fc   : > { %v1286_v39 = vpop.f32.mrb[6].mxu1 }
 0x4fd   : > { %v805_v40 = vmul.f32 %v1286_v39, %v797_v37  ;;  %v773_v41 = vpop.f32.mrb[7].mxu1 }
 0x4fe   : > { %v804_v42 = vmul.f32 %v796_v38, %v773_v41 }
 0x500   : > { %v1436_v43 = vpack.c.bf16 %v805_v40, %v804_v42 }
 0x502   : > { %1437 = vmatprep.subr.bf16.mxu1 %v1436_v43 }
 0x503   : > { %1439 = vmatpush3.bf16.msra.mxu1 %v1436_v43 }
 0x504   : > { %v1289_v46 = vpop.f32.mrb[8].mxu1 }
 0x505   : > { %v807_v47 = vmul.f32 %v1289_v46, %v799_v44  ;;  %v783_v48 = vpop.f32.mrb[9].mxu1 }
 0x506   : > { %v806_v51 = vmul.f32 %v798_v45, %v783_v48 }
 0x508   : > { %v1440_v52 = vpack.c.bf16 %v807_v47, %v806_v51 }
 0x50a   : > { %1441 = vmatprep.subr.bf16.mxu1 %v1440_v52 }
 0x50b   : > { %1443 = vmatpush3.bf16.msra.mxu1 %v1440_v52 }
 0x50c   : > { %1445 = vmatprep.subr.bf16.mxu1 %v1444_v53 }
 0x50e   : > { %1307 = vmatmul.mubr.msk.f32.vlgmr.msra.gmra.mrb[10].mxu1 %vm297_vm0, %v2101_v11 }
 0x50f   : > { %1447 = vmatpush3.bf16.msra.mxu1 %v1444_v53 }
 0x510   : > { %1449 = vmatprep.subr.bf16.mxu1 %v1448_v56 }
 0x513   : > { %1451 = vmatpush3.bf16.msra.mxu1 %v1448_v56 }
 0x514   : > { %1453 = vmatprep.subr.bf16.mxu1 %v1452_v59 }
 0x517   : > { %1455 = vmatpush3.bf16.msra.mxu1 %v1452_v59 }
 0x518   : > { %1457 = vmatprep.subr.bf16.mxu1 %v1456_v62 }
 0x51b   : > { %1459 = vmatpush3.bf16.msra.mxu1 %v1456_v62 }
 0x5e1   : > { %v1308_v63 = vpop.f32.mrb[10].mxu1 }
 0x5e2   : > { %v878_v1 = vpop.f32.mrb[11].mxu1 }
 0x5e3   : > { %1325 = vmatprep.mubr.msk.f32.mxu1 %vm297_vm0, %v878_v1 }
 0x5e4   : > { %1326 = vmatmul.mubr.msk.f32.vlgmr.msra.gmra.mrb[12].mxu1 %vm297_vm0, %v1308_v63 }
 0x6b7   : > { %v1327_v2 = vpop.f32.mrb[12].mxu1 }
 0x6b8   : > { %977 = vst.msk [vmem:[%s278_s9 + $0x8] sm:$0xff] %vm297_vm0, %v1327_v2  ;;  %v967_v3 = vpop.f32.mrb[13].mxu1 }
 0x6b9   : > { %976 = vst.msk [vmem:[%s278_s9] sm:$0xff] %vm297_vm0, %v967_v3 }
 0x6ba   : > { %1649 = shalt.err (!%p1646_p6)
}
 0x6bb   : > { %s1650_s13 = scalar_lea.hbm %s2125_s7, 256  ;;  %s1654_s15 = scalar_lea.hbm %s2177_s6, 512 }
 0x6bc   : > { %p1651_p4 = scmp.ne.s32.totalorder %s2125_s7, %s1650_s13  ;;  %p1655_p9 = scmp.lt.u32.totalorder %s2125_s7, %s2177_s6 }
 0x6bd   : > { %p1656_p10 = scmp.lt.u32.totalorder %s1654_s15, %s1650_s13  ;;  %p1658_p2 = scmp.lt.u32.totalorder %s1650_s13, %s2125_s7 }
 0x6be   : > { %p1652_p11 = pnand %p1651_p4, %p2193_p5 }
 0x6bf   : > { %p1657_p13 = por %p1656_p10, %p1655_p9 }
 0x6c0   : > { %p1653_p1 = pneg %p1652_p11 }
 0x6c1   : > { %p1659_p7 = por %p1658_p2, %p1657_p13 }
 0x6c3   : > { %p1660_p8 = pnand %p1659_p7, %p1653_p1 }
 0x6c5   : > { %1663 = shalt.err (!%p1660_p8)
}
 0x6c6   : > { %s1719_s24 = smov 128   ;;  %s1720_s18 = smov 8  }
 0x6c7   : > { %1470 = dma.vmem_to_hbm [thread:$0]  (%p2193_p5), %s2120_s23, 256, %s2125_s7, %s979_s21, %s1719_s24, %s1719_s24, %s1720_s18  }
 0x6c8 PF: > { %s1007_s11 = sand.u32 1, %s1696_s26   ;;  %p2194_p12 = scmp.ne.s32.totalorder %s2182_s8, 0 }
 0x6c9   : > { %p2195_p0 = scmp.ge.s32.totalorder %s1708_s28, 2  ;;  %s1008_s14 = scalar_lea.sflag [#allocation6], %s1007_s11 }
 0x6cb   : > { %p1484_p3 = pnand %p2195_p0, %p2194_p12 }
 0x6cd   : > { %1691 = dma.done.wait (!%p1484_p3), %s1008_s14, 256  }
 0x6ce   : > { %1693 = vsyncadd (!%p1484_p3), %s1008_s14, 4294967040  ;;  %p26_p6 = scmp.ge.s32.totalorder %s1875_s12, 4   ;;  %s2196_s26 = smov %s1700_s0 }
 0x6cf   : > { %s2197_s0 = smov %s1704_s27  ;;  %s2198_s27 = smov %s1891_s10 }
 0x6d0   : > { %s2199_s28 = smov %s1875_s12  ;;  %28 = sbr.rel (!%p26_p6) target bundleno = 21 (0x15), region = 93 }
 0x6d7   :  { %1013 = vsyncpa [#allocation5], 1 }
 0x6d8   :  { %1015 = vsyncpa [#allocation5 + $0x1], 1 }
 0x6d9   :  { %1016 = vsyncpa [#allocation8], 1 }
 0x6da   :  { %1017 = vsyncpa [#allocation6], 1 }
 0x6db   :  { %1019 = vsyncpa [#allocation6 + $0x1], 1 }

</bundles_post_ra>
